<compile_context>
chip_gen: v6e
topology: v6e:2x2x1
jax: 0.10.0
libtpu: 0.0.40
codegen_flags: <defaults>
</compile_context>

<pallas_src>
import functools

import jax
import jax.numpy as jnp
from jax.experimental import pallas as pl
from jax.experimental.pallas import tpu as pltpu


def _round_up(x, m):
    return (x + m - 1) // m * m


def _bottleneck_kernel(hs_ref, w12_ref, w3_ref, b3_ref, zs_ref, mulv_ref, *, z_dim):
    # hs_ref:   (TB, Hp)   padded activations; lane `h_dim` is a constant 1.0
    #                      (bias lane), lanes beyond that are 0.
    # w12_ref:  (Hp, Z2p)  [w1t | w2t | 0]; row `h_dim` holds [b1 | b2 | 0].
    # w3_ref:   (Z2p, Hpo) rows >= z_dim are zero; cols >= h_dim are zero.
    # b3_ref:   (1, Hpo)   fc3 bias, zero-padded past h_dim.
    hs = hs_ref[...]

    # Fused fc1|fc2 (+ both biases via the constant-1 lane): one MXU pass.
    mulv = jnp.dot(hs, w12_ref[...], preferred_element_type=jnp.float32)
    # lanes [0, z)  -> mu,  lanes [z, 2z) -> logvar,  lanes [2z, Z2p) -> 0
    mulv_ref[...] = mulv.astype(mulv_ref.dtype)

    # reparameterize (is_static=True => esp == 1):  z = mu + exp(0.5*logvar)
    # Rotate logvar onto mu's lanes (XLU), then mask lanes >= z_dim so the
    # fc3 contraction over padded lanes stays exact and NaN-free.
    z2p = mulv.shape[-1]
    lv_on_mu = pltpu.roll(mulv, shift=z2p - z_dim, axis=1)
    lane = jax.lax.broadcasted_iota(jnp.int32, mulv.shape, 1)
    z_slab = jnp.where(lane < z_dim, mulv + jnp.exp(0.5 * lv_on_mu), 0.0)
    # TODO(synk): non-static path (esp ~ N(0,1)) would take an extra noise
    # input (or pltpu.prng_random_bits) multiplied into the exp term.

    # fc3 (lane-dense output slab, single unmasked store).
    zs = jnp.dot(z_slab, w3_ref[...], preferred_element_type=jnp.float32) + b3_ref[...]
    zs_ref[...] = zs.astype(zs_ref.dtype)


def pack_params(params, h_dim, z_dim):
    """Pack nn.Linear params into padded, fused, lane-dense tensors (done once)."""
    w1t, b1, w2t, b2, w3t, b3 = params
    hp = _round_up(h_dim + 1, 128)      # +1 reserves the constant-1 bias lane
    z2p = _round_up(2 * z_dim, 128)
    hpo = _round_up(h_dim, 128)

    w12p = jnp.zeros((hp, z2p), jnp.float32)
    w12p = w12p.at[:h_dim, :z_dim].set(w1t)
    w12p = w12p.at[:h_dim, z_dim:2 * z_dim].set(w2t)
    w12p = w12p.at[h_dim, :z_dim].set(b1.reshape(-1))          # bias row
    w12p = w12p.at[h_dim, z_dim:2 * z_dim].set(b2.reshape(-1))  # bias row

    w3p = jnp.zeros((z2p, hpo), jnp.float32)
    w3p = w3p.at[:z_dim, :h_dim].set(w3t)

    b3p = jnp.zeros((1, hpo), jnp.float32).at[0, :h_dim].set(b3.reshape(-1))
    return w12p, w3p, b3p


def bottleneck_forward(hs_nchw, packed, h_dim, z_dim):
    """hs_nchw: (B, h_dim, 1, 1) f32.  Returns (zs (B,h_dim,1,1), mu, logvar)."""
    B = hs_nchw.shape[0]
    hs = hs_nchw.reshape(B, -1).astype(jnp.float32)      # Flatter

    w12p, w3p, b3p = packed
    hp, z2p = w12p.shape
    hpo = w3p.shape[1]

    # Pad batch to full sublanes and pick a batch tile (grid over batch).
    tb = min(_round_up(max(B, 1), 8), 128)
    bp = _round_up(B, tb)

    hs_p = jnp.zeros((bp, hp), jnp.float32)
    hs_p = hs_p.at[:B, :h_dim].set(hs)
    hs_p = hs_p.at[:, h_dim].set(1.0)                    # constant-1 bias lane

    grid = (bp // tb,)
    kernel = functools.partial(_bottleneck_kernel, z_dim=z_dim)

    cost = pl.CostEstimate(
        flops=2 * bp * (hp * z2p + z2p * hpo),
        transcendentals=bp * z2p,
        bytes_accessed=4 * (bp * hp + hp * z2p + z2p * hpo + hpo
                            + bp * hpo + bp * z2p),
    )

    zs_p, mulv_p = pl.pallas_call(
        kernel,
        out_shape=(
            jax.ShapeDtypeStruct((bp, hpo), jnp.float32),   # zs slab
            jax.ShapeDtypeStruct((bp, z2p), jnp.float32),   # [mu | logvar] slab
        ),
        grid=grid,
        in_specs=[
            pl.BlockSpec((tb, hp), lambda i: (i, 0)),       # activation tile
            pl.BlockSpec((hp, z2p), lambda i: (0, 0)),      # fused fc1|fc2 (resident)
            pl.BlockSpec((z2p, hpo), lambda i: (0, 0)),     # fc3 weight (resident)
            pl.BlockSpec((1, hpo), lambda i: (0, 0)),       # fc3 bias (resident)
        ],
        out_specs=(
            pl.BlockSpec((tb, hpo), lambda i: (i, 0)),
            pl.BlockSpec((tb, z2p), lambda i: (i, 0)),
        ),
        compiler_params=pltpu.CompilerParams(
            dimension_semantics=("parallel",),
        ),
        cost_estimate=cost,
    )(hs_p, w12p, w3p, b3p)

    # Strip padding / split slabs; UnFlatter.
    zs = zs_p[:B, :h_dim].reshape(B, h_dim, 1, 1)
    mu = mulv_p[:B, :z_dim]
    logvar = mulv_p[:B, z_dim:2 * z_dim]
    return zs, mu, logvar


def init_params(key, h_dim, z_dim):
    """Deterministic nn.Linear-style init (uniform(+/- 1/sqrt(fan_in))),
    weights stored pre-transposed as (in, out), biases as (1, out)."""
    ks = jax.random.split(key, 6)

    def lin(kw, kb, fan_in, fan_out):
        bound = 1.0 / jnp.sqrt(fan_in)
        w_t = jax.random.uniform(kw, (fan_in, fan_out), jnp.float32, -bound, bound)
        b = jax.random.uniform(kb, (1, fan_out), jnp.float32, -bound, bound)
        return w_t, b

    w1t, b1 = lin(ks[0], ks[1], h_dim, z_dim)   # fc1: h_dim -> z_dim
    w2t, b2 = lin(ks[2], ks[3], h_dim, z_dim)   # fc2: h_dim -> z_dim
    w3t, b3 = lin(ks[4], ks[5], z_dim, h_dim)   # fc3: z_dim -> h_dim
    return (w1t, b1, w2t, b2, w3t, b3)


if __name__ == "__main__":
    B, h_dim, z_dim = 2, 32, 8

    key = jax.random.PRNGKey(0)
    k_x, k_p = jax.random.split(key)

    # Input matches UnFlatter convention: NCHW with spatial 1x1.
    x = jax.random.normal(k_x, (B, h_dim, 1, 1), dtype=jnp.float32)
    params = init_params(k_p, h_dim, z_dim)
    packed = pack_params(params, h_dim, z_dim)

    zs, mu, logvar = bottleneck_forward(x, packed, h_dim, z_dim)
    jax.block_until_ready((zs, mu, logvar))

    # Pure-JAX reference check (is_static=True => esp = 1), using raw params.
    hs = x.reshape(B, -1)
    w1t, b1, w2t, b2, w3t, b3 = params
    mu_ref = hs @ w1t + b1
    lv_ref = hs @ w2t + b2
    z_ref = mu_ref + jnp.exp(0.5 * lv_ref)
    zs_ref = (z_ref @ w3t + b3).reshape(B, h_dim, 1, 1)

    assert zs.shape == (B, h_dim, 1, 1)
    assert mu.shape == (B, z_dim) and logvar.shape == (B, z_dim)
    assert jnp.allclose(zs, zs_ref, atol=1e-4), "zs mismatch"
    assert jnp.allclose(mu, mu_ref, atol=1e-4), "mu mismatch"
    assert jnp.allclose(logvar, lv_ref, atol=1e-4), "logvar mismatch"

    print("KERNEL_OK")
</pallas_src>

<mosaic_0001>
module attributes {stable_mosaic.version = 11 : i64} {
  func.func @_bottleneck_kernel(%arg0: i32, %arg1: memref<8x128xf32, #tpu.memory_space<vmem>>, %arg2: memref<128x128xf32, #tpu.memory_space<vmem>>, %arg3: memref<128x128xf32, #tpu.memory_space<vmem>>, %arg4: memref<1x128xf32, #tpu.memory_space<vmem>>, %arg5: memref<8x128xf32, #tpu.memory_space<vmem>>, %arg6: memref<8x128xf32, #tpu.memory_space<vmem>>) attributes {dimension_semantics = [#tpu.dimension_semantics<parallel>], iteration_bounds = array<i64: 1>, scalar_prefetch = 0 : i64, scratch_operands = 0 : i64, tpu.core_type = #tpu.core_type<tc>, window_params = [{transform_indices = @transform_0, window_bounds = array<i64: 8, 128>}, {pipeline_mode = #tpu.pipeline_mode<synchronous>, transform_indices = @transform_1, window_bounds = array<i64: 128, 128>}, {pipeline_mode = #tpu.pipeline_mode<synchronous>, transform_indices = @transform_2, window_bounds = array<i64: 128, 128>}, {pipeline_mode = #tpu.pipeline_mode<synchronous>, transform_indices = @transform_3, window_bounds = array<i64: 1, 128>}, {transform_indices = @transform_4, window_bounds = array<i64: 8, 128>}, {transform_indices = @transform_5, window_bounds = array<i64: 8, 128>}]} {
    %c0 = arith.constant 0 : index
    %c0_0 = arith.constant 0 : index
    %0 = vector.load %arg1[%c0, %c0_0] : memref<8x128xf32, #tpu.memory_space<vmem>>, vector<8x128xf32>
    %c0_1 = arith.constant 0 : index
    %c0_2 = arith.constant 0 : index
    %1 = vector.load %arg2[%c0_1, %c0_2] : memref<128x128xf32, #tpu.memory_space<vmem>>, vector<128x128xf32>
    %cst = arith.constant dense<0.000000e+00> : vector<8x128xf32>
    %2 = tpu.matmul %0, %1, %cst {dimension_numbers = #tpu.dot_dimension_numbers<[1], [0], [0], [1], [0, 0, 1, 1], [], []>} : vector<8x128xf32>, vector<128x128xf32>, vector<8x128xf32> -> vector<8x128xf32>
    %c0_3 = arith.constant 0 : index
    %c0_4 = arith.constant 0 : index
    %3 = vector.load %arg6[%c0_3, %c0_4] : memref<8x128xf32, #tpu.memory_space<vmem>>, vector<8x128xf32>
    tpu.vector_store %arg6[%c0_3, %c0_4], %2 {strides = array<i32>} : memref<8x128xf32, #tpu.memory_space<vmem>>, vector<8x128xf32>,
    %c120_i32 = arith.constant 120 : i32
    %4 = tpu.dynamic_rotate %2 by %c120_i32 dim 1 : vector<8x128xf32>, i32 -> vector<8x128xf32>
    %5 = tpu.iota {dimensions = array<i32: 1>} : vector<8x128xi32>
    %c8_i32 = arith.constant 8 : i32
    %6 = vector.broadcast %c8_i32 : i32 to vector<8x128xi32>
    %7 = arith.cmpi slt, %5, %6 : vector<8x128xi32>
    %cst_5 = arith.constant 5.000000e-01 : f32
    %8 = vector.broadcast %cst_5 : f32 to vector<8x128xf32>
    %9 = arith.mulf %8, %4 : vector<8x128xf32>
    %10 = math.exp %9 : vector<8x128xf32>
    %11 = arith.addf %2, %10 : vector<8x128xf32>
    %cst_6 = arith.constant 0.000000e+00 : f32
    %12 = vector.broadcast %cst_6 : f32 to vector<8x128xf32>
    %13 = arith.select %7, %11, %12 : vector<8x128xi1>, vector<8x128xf32>
    %c0_7 = arith.constant 0 : index
    %c0_8 = arith.constant 0 : index
    %14 = vector.load %arg3[%c0_7, %c0_8] : memref<128x128xf32, #tpu.memory_space<vmem>>, vector<128x128xf32>
    %cst_9 = arith.constant dense<0.000000e+00> : vector<8x128xf32>
    %15 = tpu.matmul %13, %14, %cst_9 {dimension_numbers = #tpu.dot_dimension_numbers<[1], [0], [0], [1], [0, 0, 1, 1], [], []>} : vector<8x128xf32>, vector<128x128xf32>, vector<8x128xf32> -> vector<8x128xf32>
    %c0_10 = arith.constant 0 : index
    %c0_11 = arith.constant 0 : index
    %16 = vector.load %arg4[%c0_10, %c0_11] : memref<1x128xf32, #tpu.memory_space<vmem>>, vector<1x128xf32>
    %17 = vector.broadcast %16 : vector<1x128xf32> to vector<8x128xf32>
    %18 = arith.addf %15, %17 : vector<8x128xf32>
    %c0_12 = arith.constant 0 : index
    %c0_13 = arith.constant 0 : index
    %19 = vector.load %arg5[%c0_12, %c0_13] : memref<8x128xf32, #tpu.memory_space<vmem>>, vector<8x128xf32>
    tpu.vector_store %arg5[%c0_12, %c0_13], %18 {strides = array<i32>} : memref<8x128xf32, #tpu.memory_space<vmem>>, vector<8x128xf32>,
    return
  }
  func.func @transform_0(%arg0: i32) -> (i32, i32) {
    %c0_i32 = arith.constant 0 : i32
    %c0_i32_0 = arith.constant 0 : i32
    return %arg0, %c0_i32 : i32, i32
  }
  func.func @transform_1(%arg0: i32) -> (i32, i32) {
    %c0_i32 = arith.constant 0 : i32
    %c0_i32_0 = arith.constant 0 : i32
    %c0_i32_1 = arith.constant 0 : i32
    return %c0_i32, %c0_i32_0 : i32, i32
  }
  func.func @transform_2(%arg0: i32) -> (i32, i32) {
    %c0_i32 = arith.constant 0 : i32
    %c0_i32_0 = arith.constant 0 : i32
    %c0_i32_1 = arith.constant 0 : i32
    return %c0_i32, %c0_i32_0 : i32, i32
  }
  func.func @transform_3(%arg0: i32) -> (i32, i32) {
    %c0_i32 = arith.constant 0 : i32
    %c0_i32_0 = arith.constant 0 : i32
    %c0_i32_1 = arith.constant 0 : i32
    return %c0_i32, %c0_i32_0 : i32, i32
  }
  func.func @transform_4(%arg0: i32) -> (i32, i32) {
    %c0_i32 = arith.constant 0 : i32
    %c0_i32_0 = arith.constant 0 : i32
    return %arg0, %c0_i32 : i32, i32
  }
  func.func @transform_5(%arg0: i32) -> (i32, i32) {
    %c0_i32 = arith.constant 0 : i32
    %c0_i32_0 = arith.constant 0 : i32
    return %arg0, %c0_i32 : i32, i32
  }
}

</mosaic_0001>

<bundles_post_ra>
// kernel: tpu_custom_call.1
= control target key start
LH: loop header
LB: loop body
LE: loop exit
PB: predicated region body
PF: predicated region fallthrough
CT: control target
= control target key end

     0   :  { %11 = vsyncpa [#allocation3], 0  ;;  %s600_s0 = inlined_call_operand.hbm [shape: f32[8,128], index: 0, kind: input, shape index: {}]   ;;  %s601_s1 = inlined_call_operand.hbm [shape: f32[128,128], index: 1, kind: input, shape index: {}]   ;;  %s602_s2 = inlined_call_operand.hbm [shape: f32[128,128], index: 2, kind: input, shape index: {}]   ;;  %s603_s3 = inlined_call_operand.vmem [shape: f32[1,128], index: 3, kind: input, shape index: {}]   ;;  %s604_s4 = inlined_call_operand.hbm [shape: f32[8,128], index: 4, kind: output, shape index: {0}]   ;;  %s605_s5 = inlined_call_operand.hbm [shape: f32[8,128], index: 5, kind: output, shape index: {1}]  }
   0x1   :  { %12 = vsyncpa [#allocation6], 0 }
   0x2   :  { %13 = vsyncpa [#allocation4], 0 }
   0x3   :  { %14 = vsyncpa [#allocation10], 0  ;;  %s508_s18 = smov [#allocation5]  }
   0x4   :  { %s30_s19 = sshll.u32 %s508_s18, 4  ;;  %s31_s19 = int_to_ptr.vmem [resolvable:$true] %s30_s19 }
   0x5   :  { %s408_s20 = scalar_lea.vmem %s31_s19, 2048  ;;  %p413_p1 = scmp.lt.s32.totalorder %s31_s19, %s31_s19 }
   0x6   :  { %p409_p0 = scmp.ne.s32.totalorder %s31_s19, %s408_s20  ;;  %p414_p2 = scmp.lt.s32.totalorder %s408_s20, %s408_s20 }
   0x8   :  { %p415_p3 = por %p414_p2, %p413_p1 }
   0xa   :  { %p416_p4 = pnand %p415_p3, %p409_p0 }
   0xc   :  { %419 = shalt.err (!%p416_p4)
}
   0xd   :  { %s509_s21 = smov 128   ;;  %s510_s22 = smov 8  }
   0xe   :  { %36 = dma.hbm_to_vmem [thread:$0]  %s601_s1, 2048, %s31_s19, [#allocation6], %s509_s21, %s509_s21, %s510_s22  }
   0xf   :  { %s511_s25 = smov [#allocation2]   ;;  %s512_s27 = smov [#allocation7]  }
  0x10   :  { %s21_s26 = sshll.u32 %s511_s25, 4  ;;  %s42_s28 = sshll.u32 %s512_s27, 4  ;;  %s22_s26 = int_to_ptr.vmem [resolvable:$true] %s21_s26  ;;  %s43_s28 = int_to_ptr.vmem [resolvable:$true] %s42_s28 }
  0x11   :  { %s428_s29 = scalar_lea.vmem %s22_s26, 128  ;;  %p433_p6 = scmp.lt.s32.totalorder %s22_s26, %s22_s26 }
  0x12   :  { %p429_p5 = scmp.ne.s32.totalorder %s22_s26, %s428_s29  ;;  %p434_p7 = scmp.lt.s32.totalorder %s428_s29, %s428_s29 }
  0x14   :  { %p435_p8 = por %p434_p7, %p433_p6 }
  0x16   :  { %p436_p9 = pnand %p435_p8, %p429_p5 }
  0x18   :  { %439 = shalt.err (!%p436_p9)
}
  0x19   :  { %24 = dma.hbm_to_vmem [thread:$0]  %s600_s0, 128, %s22_s26, [#allocation3]  }
  0x1a   :  { %s448_s7 = scalar_lea.vmem %s43_s28, 2048  ;;  %p453_p11 = scmp.lt.s32.totalorder %s43_s28, %s43_s28 }
  0x1b   :  { %p449_p10 = scmp.ne.s32.totalorder %s43_s28, %s448_s7  ;;  %p454_p12 = scmp.lt.s32.totalorder %s448_s7, %s448_s7 }
  0x1d   :  { %p455_p13 = por %p454_p12, %p453_p11 }
  0x1f   :  { %p456_p0 = pnand %p455_p13, %p449_p10 }
  0x21   :  { %459 = shalt.err (!%p456_p0)
}
  0x22   :  { %48 = dma.hbm_to_vmem [thread:$0]  %s602_s2, 2048, %s43_s28, [#allocation6], %s509_s21, %s509_s21, %s510_s22  }
  0x23   :  { %500 = dma.done.wait [#allocation3], 128  }
  0x24   :  { %501 = vsyncadd [#allocation3], 4294967168 }
  0x25   :  { %502 = dma.done.wait [#allocation6], 4096  }
  0x26   :  { %503 = vsyncadd [#allocation6], 4294963200  ;;  %v513_v0 = vmov 0.0   ;;  %vm514_vm0 = vmmov 0   ;;  %v76_v1 = vld [vmem:[#allocation5 + $0x78] sm:$0xff]  ;;  %v75_v2 = vld [vmem:[#allocation5 + $0x70] sm:$0xff]  ;;  %v150_v39 = vlaneseq }
  0x27   :  { %318 = vmatprep.subr.mxu0 %v513_v0  ;;  %350 = vmatprep.mubr.msk.f32.mxu0 %vm514_vm0, %v513_v0  ;;  %v74_v3 = vld [vmem:[#allocation5 + $0x68] sm:$0xff]  ;;  %v73_v4 = vld [vmem:[#allocation5 + $0x60] sm:$0xff]  ;;  %v72_v5 = vld [vmem:[#allocation5 + $0x58] sm:$0xff]  ;;  %s515_s0 = smov 120   ;;  %s516_s2 = smov [#allocation9]  }
  0x28   :  { %353 = vmatprep.subr.mxu1 %v513_v0  ;;  %385 = vmatprep.mubr.msk.f32.mxu1 %vm514_vm0, %v513_v0  ;;  %v71_v6 = vld [vmem:[#allocation5 + $0x50] sm:$0xff]  ;;  %v70_v7 = vld [vmem:[#allocation5 + $0x48] sm:$0xff]  ;;  %v69_v8 = vld [vmem:[#allocation5 + $0x40] sm:$0xff]  ;;  %v151_v40 = vand.u32 127, %v150_v39  ;;  %s268_s9 = sshll.u32 %s516_s2, 4  ;;  %s269_s9 = int_to_ptr.vmem [resolvable:$true] %s268_s9 }
  0x29   :  { %319 = vmatpush3.msra.mxu0 %v76_v1  ;;  %v68_v9 = vld [vmem:[#allocation5 + $0x38] sm:$0xff]  ;;  %v67_v10 = vld [vmem:[#allocation5 + $0x30] sm:$0xff]  ;;  %v66_v11 = vld [vmem:[#allocation5 + $0x28] sm:$0xff]  ;;  %s460_s10 = scalar_lea.vmem %s269_s9, 128  ;;  %p465_p2 = scmp.lt.s32.totalorder %s269_s9, %s269_s9 }
  0x2a   :  { %320 = vmatprep.subr.mxu0 %v513_v0  ;;  %v65_v12 = vld [vmem:[#allocation5 + $0x20] sm:$0xff]  ;;  %v64_v13 = vld [vmem:[#allocation5 + $0x18] sm:$0xff]  ;;  %v63_v14 = vld [vmem:[#allocation5 + $0x10] sm:$0xff]  ;;  %vm152_vm1 = vcmp.lt.s32.totalorder %v151_v40, 8  ;;  %p461_p1 = scmp.ne.s32.totalorder %s269_s9, %s460_s10  ;;  %p466_p3 = scmp.lt.s32.totalorder %s460_s10, %s460_s10 }
  0x2b   :  { %321 = vmatpush3.msra.mxu0 %v75_v2  ;;  %v62_v15 = vld [vmem:[#allocation5 + $0x8] sm:$0xff]  ;;  %v61_v16 = vld [vmem:[#allocation5] sm:$0xff]  ;;  %v60_v17 = vld [vmem:[#allocation2] sm:$0xff] }
  0x2c   :  { %322 = vmatprep.subr.mxu0 %v513_v0  ;;  %v173_v18 = vld [vmem:[#allocation7 + $0x78] sm:$0xff]  ;;  %v172_v19 = vld [vmem:[#allocation7 + $0x70] sm:$0xff]  ;;  %v171_v20 = vld [vmem:[#allocation7 + $0x68] sm:$0xff]  ;;  %p467_p4 = por %p466_p3, %p465_p2 }
  0x2d   :  { %323 = vmatpush3.msra.mxu0 %v74_v3  ;;  %354 = vmatpush3.msra.mxu1 %v173_v18  ;;  %v170_v21 = vld [vmem:[#allocation7 + $0x60] sm:$0xff]  ;;  %v169_v22 = vld [vmem:[#allocation7 + $0x58] sm:$0xff]  ;;  %v168_v23 = vld [vmem:[#allocation7 + $0x50] sm:$0xff] }
  0x2e   :  { %324 = vmatprep.subr.mxu0 %v513_v0  ;;  %355 = vmatprep.subr.mxu1 %v513_v0  ;;  %v167_v24 = vld [vmem:[#allocation7 + $0x48] sm:$0xff]  ;;  %v166_v25 = vld [vmem:[#allocation7 + $0x40] sm:$0xff]  ;;  %v165_v26 = vld [vmem:[#allocation7 + $0x38] sm:$0xff]  ;;  %p468_p5 = pnand %p467_p4, %p461_p1 }
  0x2f   :  { %325 = vmatpush3.msra.mxu0 %v73_v4  ;;  %356 = vmatpush3.msra.mxu1 %v172_v19  ;;  %v164_v27 = vld [vmem:[#allocation7 + $0x30] sm:$0xff]  ;;  %v163_v28 = vld [vmem:[#allocation7 + $0x28] sm:$0xff]  ;;  %v162_v29 = vld [vmem:[#allocation7 + $0x20] sm:$0xff] }
  0x30   :  { %326 = vmatprep.subr.mxu0 %v513_v0  ;;  %357 = vmatprep.subr.mxu1 %v513_v0  ;;  %v161_v30 = vld [vmem:[#allocation7 + $0x18] sm:$0xff]  ;;  %v160_v32 = vld [vmem:[#allocation7 + $0x10] sm:$0xff]  ;;  %v159_v34 = vld [vmem:[#allocation7 + $0x8] sm:$0xff] }
  0x31   :  { %327 = vmatpush3.msra.mxu0 %v72_v5  ;;  %358 = vmatpush3.msra.mxu1 %v171_v20  ;;  %v158_v35 = vld [vmem:[#allocation7] sm:$0xff] }
  0x32   :  { %328 = vmatprep.subr.mxu0 %v513_v0  ;;  %359 = vmatprep.subr.mxu1 %v513_v0 }
  0x33   :  { %329 = vmatpush3.msra.mxu0 %v71_v6  ;;  %360 = vmatpush3.msra.mxu1 %v170_v21 }
  0x34   :  { %330 = vmatprep.subr.mxu0 %v513_v0  ;;  %361 = vmatprep.subr.mxu1 %v513_v0 }
  0x35   :  { %331 = vmatpush3.msra.mxu0 %v70_v7  ;;  %362 = vmatpush3.msra.mxu1 %v169_v22 }
  0x36   :  { %332 = vmatprep.subr.mxu0 %v513_v0  ;;  %363 = vmatprep.subr.mxu1 %v513_v0 }
  0x37   :  { %333 = vmatpush3.msra.mxu0 %v69_v8  ;;  %364 = vmatpush3.msra.mxu1 %v168_v23 }
  0x38   :  { %334 = vmatprep.subr.mxu0 %v513_v0  ;;  %365 = vmatprep.subr.mxu1 %v513_v0 }
  0x39   :  { %335 = vmatpush3.msra.mxu0 %v68_v9  ;;  %366 = vmatpush3.msra.mxu1 %v167_v24 }
  0x3a   :  { %336 = vmatprep.subr.mxu0 %v513_v0  ;;  %367 = vmatprep.subr.mxu1 %v513_v0 }
  0x3b   :  { %337 = vmatpush3.msra.mxu0 %v67_v10  ;;  %368 = vmatpush3.msra.mxu1 %v166_v25 }
  0x3c   :  { %338 = vmatprep.subr.mxu0 %v513_v0  ;;  %369 = vmatprep.subr.mxu1 %v513_v0 }
  0x3d   :  { %339 = vmatpush3.msra.mxu0 %v66_v11  ;;  %370 = vmatpush3.msra.mxu1 %v165_v26 }
  0x3e   :  { %340 = vmatprep.subr.mxu0 %v513_v0  ;;  %371 = vmatprep.subr.mxu1 %v513_v0 }
  0x3f   :  { %341 = vmatpush3.msra.mxu0 %v65_v12  ;;  %372 = vmatpush3.msra.mxu1 %v164_v27 }
  0x40   :  { %342 = vmatprep.subr.mxu0 %v513_v0  ;;  %373 = vmatprep.subr.mxu1 %v513_v0 }
  0x41   :  { %343 = vmatpush3.msra.mxu0 %v64_v13  ;;  %374 = vmatpush3.msra.mxu1 %v163_v28 }
  0x42   :  { %344 = vmatprep.subr.mxu0 %v513_v0  ;;  %375 = vmatprep.subr.mxu1 %v513_v0 }
  0x43   :  { %345 = vmatpush3.msra.mxu0 %v63_v14  ;;  %376 = vmatpush3.msra.mxu1 %v162_v29 }
  0x44   :  { %346 = vmatprep.subr.mxu0 %v513_v0  ;;  %377 = vmatprep.subr.mxu1 %v513_v0 }
  0x45   :  { %347 = vmatpush3.msra.mxu0 %v62_v15  ;;  %378 = vmatpush3.msra.mxu1 %v161_v30 }
  0x46   :  { %348 = vmatprep.subr.mxu0 %v513_v0  ;;  %379 = vmatprep.subr.mxu1 %v513_v0 }
  0x47   :  { %349 = vmatpush3.msra.mxu0 %v61_v16  ;;  %380 = vmatpush3.msra.mxu1 %v160_v32 }
  0x48   :  { %351 = vmatmul.mubr.f32.vlgmr.msra.gmra.mxu0 %v60_v17  ;;  %381 = vmatprep.subr.mxu1 %v513_v0 }
  0x49   :  { %382 = vmatpush3.msra.mxu1 %v159_v34 }
  0x4a   :  { %383 = vmatprep.subr.mxu1 %v513_v0 }
  0x4b   :  { %384 = vmatpush3.msra.mxu1 %v158_v35 }
 0x108   :  { %v143_v31 = vpop.f32.mrf.mxu0 }
 0x109   :  { %147 = vst [vmem:[#allocation9] sm:$0xff] %v143_v31  ;;  %148 = vrot.lane.b32.xlu0 %v143_v31, %s515_s0 }
 0x10a   :  { %v352_v33 = vpop.f32.mrf.mxu0 }
 0x17b   :  { %v149_v36 = vpop.permute.xlu0 %148 }
 0x17c   :  { %v153_v37 = vmul.f32 0.5, %v149_v36 }
 0x17e   :  { %v154_v38 = vmul.f32 1.442695, %v153_v37 }
 0x180   :  { %398 = vpow2.f32 %v154_v38 }
 0x18d   :  { %v399_v41 = vpop.eup %398 }
 0x18e   :  { %v156_v42 = vadd.f32 %v399_v41, %v143_v31 }
 0x190   :  { %386 = vmatmul.mubr.msk.f32.vlgmr.msra.gmra.mxu1 %vm152_vm1, %v156_v42 }
 0x191   :  { %471 = shalt.err (!%p468_p5)
}
 0x192   :  { %271 = dma.vmem_to_hbm [thread:$0]  %s269_s9, 128, %s605_s5, [#allocation10]   ;;  %v282_v43 = vld [vmem:[%s603_s3] ss:$0 sm:$0xff] }
 0x193   :  { %s517_s15 = smov [#allocation8]  }
 0x194   :  { %s258_s16 = sshll.u32 %s517_s15, 4  ;;  %s259_s16 = int_to_ptr.vmem [resolvable:$true] %s258_s16 }
 0x195   :  { %s480_s17 = scalar_lea.vmem %s259_s16, 128  ;;  %p485_p7 = scmp.lt.s32.totalorder %s259_s16, %s259_s16 }
 0x196   :  { %p481_p6 = scmp.ne.s32.totalorder %s259_s16, %s480_s17  ;;  %p486_p8 = scmp.lt.s32.totalorder %s480_s17, %s480_s17 }
 0x198   :  { %p487_p9 = por %p486_p8, %p485_p7 }
 0x19a   :  { %p488_p10 = pnand %p487_p9, %p481_p6 }
 0x250   :  { %v247_v44 = vpop.f32.mrf.mxu1 }
 0x251   :  { %v248_v45 = vadd.f32 %v282_v43, %v247_v44 }
 0x252   :  { %v387_v46 = vpop.f32.mrf.mxu1 }
 0x253   :  { %251 = vst [vmem:[#allocation8] sm:$0xff] %v248_v45 }
 0x254   :  { %491 = shalt.err (!%p488_p10)
}
 0x255   :  { %261 = dma.vmem_to_hbm [thread:$0]  %s259_s16, 128, %s604_s4, [#allocation4]  }
 0x256   :  { %504 = dma.done.wait [#allocation4], 128  }
 0x257   :  { %505 = vsyncadd [#allocation4], 4294967168 }
 0x258   :  { %506 = dma.done.wait [#allocation10], 128  }
 0x259   :  { %507 = vsyncadd [#allocation10], 4294967168 }
 0x25a   :  { %278 = vsyncpa [#allocation3], 1 }
 0x25b   :  { %279 = vsyncpa [#allocation6], 1 }
 0x25c   :  { %280 = vsyncpa [#allocation4], 1 }
 0x25d   :  { %281 = vsyncpa [#allocation10], 1 }

</bundles_post_ra>
